<compile_context>
chip_gen: v7x
topology: tpu7x:2x2x1
jax: 0.10.0
libtpu: 0.0.40
codegen_flags: <defaults>
</compile_context>

<pallas_src>
import jax
import jax.numpy as jnp
from jax.experimental import pallas as pl
from jax.experimental.pallas import tpu as pltpu


def _round_up(n, m):
    return ((n + m - 1) // m) * m


def _mlp_kernel(x_ref, wb_ref, out_ref):
    # x_ref  : (1, TB)  batch on the lane axis (lane-dense load/store)
    # wb_ref : (H, 4)   packed params: [:,0]=w1, [:,1]=b1, [:,2]=w2, [0,3]=b2
    # out_ref: (1, TB)  lane-dense output
    x = x_ref[...]                                     # (1, TB)
    w1 = wb_ref[:, 0:1]                                # (H, 1) static slices: free views
    b1 = wb_ref[:, 1:2]
    w2 = wb_ref[:, 2:3]
    b2 = wb_ref[0:1, 3:4]                              # (1, 1)

    # Layer 1: hidden[j, b] = relu(w1[j] * x[b] + b1[j])  -- pure VPU (K == 1, no MXU)
    h = jnp.maximum(w1 * x + b1, 0.0)                  # (H, TB)
    # Layer 2: out[b] = sum_j w2[j] * h[j, b] + b2        -- XLU sublane reduce (N == 1)
    o = jnp.sum(w2 * h, axis=0, keepdims=True) + b2    # (1, TB)
    out_ref[...] = o.astype(out_ref.dtype)


def net_forward(x, w1, b1, w2, b2, *, tile_b=2048):
    """Fused forward pass of Net: relu(x @ w1.T + b1) @ w2.T + b2.

    Weights are in PyTorch layout:
      x : (B, 1)    w1: (n_hidden, 1)   b1: (n_hidden,)
      w2: (1, n_hidden)                 b2: (1,)
    Returns (B, 1) float32.
    """
    B, n_features = x.shape
    n_hidden = w1.shape[0]
    n_output = w2.shape[0]
    # Kernel is specialized to the tutorial shapes (degenerate matmuls).
    assert n_features == 1 and n_output == 1, "kernel specialized for Net(1, H, 1)"

    # Batch tile on the lane axis: lane-aligned (multiple of 128), clamped so the
    # tutorial size (B=1000 -> TB=1024) collapses to a single grid step.
    TB = min(_round_up(tile_b, 128), _round_up(B, 128))
    grid_b = pl.cdiv(B, TB)  # ragged last block handled by Pallas (reads padded, writes clipped)

    # Contiguous (B,1)->(1,B): metadata-only, no copy.
    x_t = x.reshape(1, B).astype(jnp.float32)

    # Pack all parameters into one tiny (H, 4) block -> single VMEM-resident DMA.
    # (In a training loop, hoist this packing out and reuse it across steps.)
    wb = jnp.concatenate(
        [
            w1.reshape(n_hidden, 1),
            b1.reshape(n_hidden, 1),
            w2.reshape(n_hidden, 1),
            jnp.broadcast_to(b2.reshape(1, 1), (n_hidden, 1)),  # only [0, 3] is read
        ],
        axis=1,
    ).astype(jnp.float32)

    cost = pl.CostEstimate(
        flops=5 * n_hidden * B,              # mul+add+relu (layer 1) + mul+add (layer 2)
        transcendentals=0,
        bytes_accessed=8 * B + 16 * n_hidden,  # read x, write out, tiny weight block
    )

    out_t = pl.pallas_call(
        _mlp_kernel,
        out_shape=jax.ShapeDtypeStruct((1, B), jnp.float32),
        grid=(grid_b,),
        in_specs=[
            pl.BlockSpec((1, TB), lambda i: (0, i)),            # x: batch-tiled on lanes
            pl.BlockSpec((n_hidden, 4), lambda i: (0, 0)),      # packed params: VMEM-resident
        ],
        out_specs=pl.BlockSpec((1, TB), lambda i: (0, i)),
        compiler_params=pltpu.CompilerParams(
            # grid is (1,) at the tutorial size; with large B the independent
            # batch tiles shard across v7x's 2 TensorCores.
            dimension_semantics=("parallel",),
        ),
        cost_estimate=cost,
    )(x_t, wb)

    # Contiguous (1,B)->(B,1): metadata-only, no copy, no slice.
    return out_t.reshape(B, 1)


def init_params(key, n_features, n_hidden, n_output):
    """torch.nn.Linear default init: U(-1/sqrt(fan_in), 1/sqrt(fan_in))."""
    k1, k2, k3, k4 = jax.random.split(key, 4)
    lim1 = 1.0 / jnp.sqrt(jnp.float32(n_features))
    lim2 = 1.0 / jnp.sqrt(jnp.float32(n_hidden))
    w1 = jax.random.uniform(k1, (n_hidden, n_features), jnp.float32, -lim1, lim1)
    b1 = jax.random.uniform(k2, (n_hidden,), jnp.float32, -lim1, lim1)
    w2 = jax.random.uniform(k3, (n_output, n_hidden), jnp.float32, -lim2, lim2)
    b2 = jax.random.uniform(k4, (n_output,), jnp.float32, -lim2, lim2)
    return w1, b1, w2, b2


if __name__ == "__main__":
    # Tutorial: Net(1, 20, 1), x = unsqueeze(linspace(-1, 1, 1000), dim=1)
    B, n_features, n_hidden, n_output = 1000, 1, 20, 1

    key = jax.random.PRNGKey(0)
    w1, b1, w2, b2 = init_params(key, n_features, n_hidden, n_output)

    x = jnp.linspace(-1.0, 1.0, B, dtype=jnp.float32)[:, None]

    out = net_forward(x, w1, b1, w2, b2)
    out = jax.block_until_ready(out)

    # Pure-JAX reference (same math, no MXU involved).
    h_ref = jnp.maximum(x * w1.reshape(1, n_hidden) + b1.reshape(1, n_hidden), 0.0)
    ref = jnp.sum(h_ref * w2.reshape(1, n_hidden), axis=1, keepdims=True) + b2.reshape(1, 1)

    assert out.shape == (B, n_output)
    assert jnp.allclose(out, ref, atol=1e-5, rtol=1e-5), float(jnp.max(jnp.abs(out - ref)))

    print("KERNEL_OK")
</pallas_src>

<mosaic_0001>
module attributes {stable_mosaic.version = 11 : i64} {
  func.func @_mlp_kernel(%arg0: i32, %arg1: memref<1x1024xf32, #tpu.memory_space<vmem>>, %arg2: memref<20x4xf32, #tpu.memory_space<vmem>>, %arg3: memref<1x1024xf32, #tpu.memory_space<vmem>>) attributes {dimension_semantics = [#tpu.dimension_semantics<parallel>], iteration_bounds = array<i64: 1>, scalar_prefetch = 0 : i64, scratch_operands = 0 : i64, tpu.core_type = #tpu.core_type<tc>, window_params = [{transform_indices = @transform_0, window_bounds = array<i64: 1, 1024>}, {pipeline_mode = #tpu.pipeline_mode<synchronous>, transform_indices = @transform_1, window_bounds = array<i64: 20, 4>}, {transform_indices = @transform_2, window_bounds = array<i64: 1, 1024>}]} {
    %c0 = arith.constant 0 : index
    %c0_0 = arith.constant 0 : index
    %0 = vector.load %arg1[%c0, %c0_0] : memref<1x1024xf32, #tpu.memory_space<vmem>>, vector<1x1024xf32>
    %c0_1 = arith.constant 0 : index
    %c0_2 = arith.constant 0 : index
    %1 = vector.load %arg2[%c0_1, %c0_2] : memref<20x4xf32, #tpu.memory_space<vmem>>, vector<20x1xf32>
    %c0_3 = arith.constant 0 : index
    %c1 = arith.constant 1 : index
    %2 = vector.load %arg2[%c0_3, %c1] : memref<20x4xf32, #tpu.memory_space<vmem>>, vector<20x1xf32>
    %c0_4 = arith.constant 0 : index
    %c2 = arith.constant 2 : index
    %3 = vector.load %arg2[%c0_4, %c2] : memref<20x4xf32, #tpu.memory_space<vmem>>, vector<20x1xf32>
    %c0_5 = arith.constant 0 : index
    %c3 = arith.constant 3 : index
    %4 = vector.load %arg2[%c0_5, %c3] : memref<20x4xf32, #tpu.memory_space<vmem>>, vector<1x1xf32>
    %5 = vector.broadcast %1 : vector<20x1xf32> to vector<20x1024xf32>
    %6 = vector.broadcast %0 : vector<1x1024xf32> to vector<20x1024xf32>
    %7 = arith.mulf %5, %6 : vector<20x1024xf32>
    %8 = vector.broadcast %2 : vector<20x1xf32> to vector<20x1024xf32>
    %9 = arith.addf %7, %8 : vector<20x1024xf32>
    %cst = arith.constant 0.000000e+00 : f32
    %10 = vector.broadcast %cst : f32 to vector<20x1024xf32>
    %11 = arith.maximumf %9, %10 : vector<20x1024xf32>
    %12 = vector.broadcast %3 : vector<20x1xf32> to vector<20x1024xf32>
    %13 = arith.mulf %12, %11 : vector<20x1024xf32>
    %cst_6 = arith.constant dense<0.000000e+00> : vector<1024xf32>
    %14 = vector.multi_reduction <add>, %13, %cst_6 [0] : vector<20x1024xf32> to vector<1024xf32>
    %15 = vector.shape_cast %14 : vector<1024xf32> to vector<1x1024xf32>
    %16 = vector.broadcast %4 : vector<1x1xf32> to vector<1x1024xf32>
    %17 = arith.addf %15, %16 : vector<1x1024xf32>
    %c0_7 = arith.constant 0 : index
    %c0_8 = arith.constant 0 : index
    %18 = vector.load %arg3[%c0_7, %c0_8] : memref<1x1024xf32, #tpu.memory_space<vmem>>, vector<1x1024xf32>
    tpu.vector_store %arg3[%c0_7, %c0_8], %17 {strides = array<i32>} : memref<1x1024xf32, #tpu.memory_space<vmem>>, vector<1x1024xf32>,
    return
  }
  func.func @transform_0(%arg0: i32) -> (i32, i32) {
    %c0_i32 = arith.constant 0 : i32
    %c0_i32_0 = arith.constant 0 : i32
    return %c0_i32, %arg0 : i32, i32
  }
  func.func @transform_1(%arg0: i32) -> (i32, i32) {
    %c0_i32 = arith.constant 0 : i32
    %c0_i32_0 = arith.constant 0 : i32
    %c0_i32_1 = arith.constant 0 : i32
    return %c0_i32, %c0_i32_0 : i32, i32
  }
  func.func @transform_2(%arg0: i32) -> (i32, i32) {
    %c0_i32 = arith.constant 0 : i32
    %c0_i32_0 = arith.constant 0 : i32
    return %c0_i32, %arg0 : i32, i32
  }
}

</mosaic_0001>

<bundles_post_ra>
// kernel: tpu_custom_call.1
= control target key start
LH: loop header
LB: loop body
LE: loop exit
PB: predicated region body
PF: predicated region fallthrough
CT: control target
= control target key end

     0   :  { %v390_v2 = vmov 0   ;;  %s454_s0 = inlined_call_operand.vmem [shape: f32[1,1000], index: 0, kind: input, shape index: {}]   ;;  %s455_s1 = inlined_call_operand.vmem [shape: f32[20,4], index: 1, kind: input, shape index: {}]   ;;  %s456_s2 = inlined_call_operand.hbm [shape: f32[1,1000], index: 2, kind: output, shape index: {}]  }
   0x1   :  { %v15_v0 = vld [vmem:[%s455_s1 + $0x10] sm:$0xf]  ;;  %v13_v1 = vld [vmem:[%s455_s1] sm:$0xff]  ;;  %359 = vset.pattern.permute.xlu1 %v390_v2  ;;  %358 = vset.pattern.permute.xlu0 %v390_v2 }
   0x2   :  { %29 = vperm.xlu1 %359, %v15_v0   ;;  %19 = vperm.xlu0 %358, %v13_v1  }
   0x3   :  { %7 = vsyncpa [#allocation3], 0  ;;  %v14_v3 = vld [vmem:[%s455_s1 + $0x8] sm:$0xff]  ;;  %v391_v4 = vmov 1   ;;  %v392_v5 = vmov 2   ;;  %v393_v6 = vmov 3   ;;  %v33_v8 = vlaneseq }
   0x4   :  { %v16_v7 = vld [vmem:[%s455_s1] sm:$0x1]  ;;  %v394_v10 = vmov 1966171168   ;;  %vm194_vm0 = vcmask 1043456  }
   0x5   :  { %v34_v9 = vshrl.u32 %v33_v8, 7  ;;  %v292_v11 = vunpack.c.l.s4 %v394_v10  ;;  %v12_v20 = vld [vmem:[%s454_s0] sm:$0xff]  ;;  %s395_s0 = smov [#allocation2]  }
   0x6   :  { %360 = vset.pattern.permute.xlu1 %v391_v4  ;;  %24 = vperm.xlu0 %358, %v14_v3   ;;  %s344_s1 = sshll.u32 %s395_s0, 4  ;;  %s345_s1 = int_to_ptr.vmem [resolvable:$true] %s344_s1 }
   0x7   :  { %98 = vperm.xlu1 %360, %v13_v1   ;;  %v35_v12 = vsub.s32 0, %v34_v9  ;;  %v39_v13 = vsub.s32 1, %v34_v9  ;;  %v43_v14 = vsub.s32 2, %v34_v9  ;;  %v47_v15 = vsub.s32 3, %v34_v9  ;;  %s366_s19 = scalar_lea.vmem %s345_s1, 128  ;;  %p371_p1 = scmp.lt.s32.totalorder %s345_s1, %s345_s1 }
   0x8   :  { %v51_v16 = vsub.s32 4, %v34_v9  ;;  %v55_v17 = vsub.s32 5, %v34_v9  ;;  %v59_v18 = vsub.s32 6, %v34_v9  ;;  %v63_v19 = vsub.s32 7, %v34_v9  ;;  %p367_p0 = scmp.ne.s32.totalorder %s345_s1, %s366_s19  ;;  %p372_p2 = scmp.lt.s32.totalorder %s366_s19, %s366_s19 }
   0x9   :  { %v293_v21 = vunpack.c.0.s8 %v292_v11  ;;  %v36_v22 = vrot.slane %v12_v20, %v35_v12  ;;  %v40_v23 = vrot.slane %v12_v20, %v39_v13  ;;  %v44_v24 = vrot.slane %v12_v20, %v43_v14 }
   0xa   :  { %361 = vset.pattern.permute.xlu0 %v391_v4  ;;  %v48_v25 = vrot.slane %v12_v20, %v47_v15  ;;  %v52_v26 = vrot.slane %v12_v20, %v51_v16  ;;  %v56_v27 = vrot.slane %v12_v20, %v55_v17  ;;  %v60_v28 = vrot.slane %v12_v20, %v59_v18  ;;  %p373_p3 = por %p372_p2, %p371_p1 }
   0xb   :  { %106 = vperm.xlu1 %360, %v15_v0   ;;  %102 = vperm.xlu0 %361, %v14_v3   ;;  %v64_v29 = vrot.slane %v12_v20, %v63_v19  ;;  %v426_v32 = vsub.s32 %v293_v21, %v34_v9 }
   0xc   :  { %p374_p4 = pnand %p373_p3, %p367_p0 }
   0xf   :  { %362 = vset.pattern.permute.xlu1 %v392_v5  ;;  %363 = vset.pattern.permute.xlu0 %v392_v5 }
  0x10   :  { %158 = vperm.xlu1 %362, %v13_v1   ;;  %162 = vperm.xlu0 %363, %v14_v3  }
  0x14   :  { %166 = vperm.xlu1 %362, %v15_v0   ;;  %365 = vset.pattern.permute.xlu0 %v393_v6 }
  0x18   :  { %364 = vset.pattern.permute.xlu1 %v393_v6 }
  0x19   :  { %268 = vperm.xlu1 %364, %v16_v7  }
  0x81   :  { %v30_v30 = vpop.permute.xlu1 %29  ;;  %v20_v31 = vpop.permute.xlu0 %19 }
  0x82   :  { %v89_v33 = vmul.f32 %v36_v22, %v30_v30  ;;  %v90_v34 = vmul.f32 %v40_v23, %v30_v30  ;;  %v91_v35 = vmul.f32 %v44_v24, %v30_v30  ;;  %v92_v36 = vmul.f32 %v48_v25, %v30_v30 }
  0x83   :  { %v93_v37 = vmul.f32 %v52_v26, %v30_v30  ;;  %v94_v38 = vmul.f32 %v56_v27, %v30_v30  ;;  %v95_v39 = vmul.f32 %v60_v28, %v30_v30  ;;  %v96_v40 = vmul.f32 %v64_v29, %v30_v30 }
  0x84   :  { %v73_v41 = vmul.f32 %v36_v22, %v20_v31  ;;  %v74_v42 = vmul.f32 %v40_v23, %v20_v31  ;;  %v75_v43 = vmul.f32 %v44_v24, %v20_v31  ;;  %v76_v44 = vmul.f32 %v48_v25, %v20_v31 }
  0x85   :  { %v77_v45 = vmul.f32 %v52_v26, %v20_v31  ;;  %v78_v46 = vmul.f32 %v56_v27, %v20_v31  ;;  %v79_v47 = vmul.f32 %v60_v28, %v20_v31  ;;  %v80_v48 = vmul.f32 %v64_v29, %v20_v31  ;;  %v25_v49 = vpop.permute.xlu0 %24 }
  0x86   :  { %v81_v50 = vmul.f32 %v36_v22, %v25_v49  ;;  %v82_v51 = vmul.f32 %v40_v23, %v25_v49  ;;  %v83_v52 = vmul.f32 %v44_v24, %v25_v49  ;;  %v84_v53 = vmul.f32 %v48_v25, %v25_v49  ;;  %v99_v54 = vpop.permute.xlu1 %98 }
  0x87   :  { %v85_v55 = vmul.f32 %v52_v26, %v25_v49  ;;  %v86_v56 = vmul.f32 %v56_v27, %v25_v49  ;;  %v87_v57 = vmul.f32 %v60_v28, %v25_v49  ;;  %v88_v58 = vmul.f32 %v64_v29, %v25_v49 }
  0x88   :  { %v109_v59 = vadd.f32 %v99_v54, %v73_v41  ;;  %v110_v60 = vadd.f32 %v99_v54, %v74_v42  ;;  %v111_v61 = vadd.f32 %v99_v54, %v75_v43  ;;  %v112_v62 = vadd.f32 %v99_v54, %v76_v44 }
  0x89   :  { %v113_v63 = vadd.f32 %v99_v54, %v77_v45  ;;  %v114_v0 = vadd.f32 %v99_v54, %v78_v46  ;;  %v115_v1 = vadd.f32 %v99_v54, %v79_v47  ;;  %v116_v2 = vadd.f32 %v99_v54, %v80_v48 }
  0x8a   :  { %v133_v3 = vmax.f32 %v109_v59, 0.0  ;;  %v134_v4 = vmax.f32 %v110_v60, 0.0  ;;  %v135_v5 = vmax.f32 %v111_v61, 0.0  ;;  %v136_v6 = vmax.f32 %v112_v62, 0.0  ;;  %v107_v7 = vpop.permute.xlu1 %106  ;;  %v103_v20 = vpop.permute.xlu0 %102 }
  0x8b   :  { %v137_v8 = vmax.f32 %v113_v63, 0.0  ;;  %v138_v9 = vmax.f32 %v114_v0, 0.0  ;;  %v139_v10 = vmax.f32 %v115_v1, 0.0  ;;  %v140_v11 = vmax.f32 %v116_v2, 0.0 }
  0x8c   :  { %v125_v12 = vadd.f32 %v107_v7, %v89_v33  ;;  %v126_v13 = vadd.f32 %v107_v7, %v90_v34  ;;  %v127_v14 = vadd.f32 %v107_v7, %v91_v35  ;;  %v128_v15 = vadd.f32 %v107_v7, %v92_v36 }
  0x8d   :  { %v129_v16 = vadd.f32 %v107_v7, %v93_v37  ;;  %v130_v17 = vadd.f32 %v107_v7, %v94_v38  ;;  %v131_v18 = vadd.f32 %v107_v7, %v95_v39  ;;  %v132_v19 = vadd.f32 %v107_v7, %v96_v40 }
  0x8e   :  { %v149_v21 = vmax.f32 %v125_v12, 0.0  ;;  %v150_v22 = vmax.f32 %v126_v13, 0.0  ;;  %v151_v23 = vmax.f32 %v127_v14, 0.0  ;;  %v152_v24 = vmax.f32 %v128_v15, 0.0 }
  0x8f   :  { %v153_v25 = vmax.f32 %v129_v16, 0.0  ;;  %v154_v26 = vmax.f32 %v130_v17, 0.0  ;;  %v155_v27 = vmax.f32 %v131_v18, 0.0  ;;  %v156_v28 = vmax.f32 %v132_v19, 0.0  ;;  %v159_v34 = vpop.permute.xlu1 %158  ;;  %v163_v43 = vpop.permute.xlu0 %162 }
  0x90   :  { %v117_v29 = vadd.f32 %v103_v20, %v81_v50  ;;  %v118_v30 = vadd.f32 %v103_v20, %v82_v51  ;;  %v119_v31 = vadd.f32 %v103_v20, %v83_v52  ;;  %v120_v33 = vadd.f32 %v103_v20, %v84_v53 }
  0x91   :  { %v121_v35 = vadd.f32 %v103_v20, %v85_v55  ;;  %v122_v36 = vadd.f32 %v103_v20, %v86_v56  ;;  %v123_v37 = vadd.f32 %v103_v20, %v87_v57  ;;  %v124_v38 = vadd.f32 %v103_v20, %v88_v58 }
  0x92   :  { %v141_v39 = vmax.f32 %v117_v29, 0.0  ;;  %v142_v40 = vmax.f32 %v118_v30, 0.0  ;;  %v143_v41 = vmax.f32 %v119_v31, 0.0  ;;  %v144_v42 = vmax.f32 %v120_v33, 0.0 }
  0x93   :  { %v145_v44 = vmax.f32 %v121_v35, 0.0  ;;  %v146_v45 = vmax.f32 %v122_v36, 0.0  ;;  %v147_v46 = vmax.f32 %v123_v37, 0.0  ;;  %v148_v47 = vmax.f32 %v124_v38, 0.0  ;;  %v167_v0 = vpop.permute.xlu1 %166 }
  0x94   :  { %v169_v48 = vmul.f32 %v159_v34, %v133_v3  ;;  %v170_v49 = vmul.f32 %v159_v34, %v134_v4  ;;  %v171_v50 = vmul.f32 %v159_v34, %v135_v5  ;;  %v172_v51 = vmul.f32 %v159_v34, %v136_v6 }
  0x95   :  { %v173_v52 = vmul.f32 %v159_v34, %v137_v8  ;;  %v174_v53 = vmul.f32 %v159_v34, %v138_v9  ;;  %v175_v54 = vmul.f32 %v159_v34, %v139_v10  ;;  %v176_v55 = vmul.f32 %v159_v34, %v140_v11 }
  0x96   :  { %v177_v56 = vmul.f32 %v163_v43, %v141_v39  ;;  %v178_v57 = vmul.f32 %v163_v43, %v142_v40  ;;  %v179_v58 = vmul.f32 %v163_v43, %v143_v41  ;;  %v180_v59 = vmul.f32 %v163_v43, %v144_v42 }
  0x97   :  { %v181_v60 = vmul.f32 %v163_v43, %v145_v44  ;;  %v182_v61 = vmul.f32 %v163_v43, %v146_v45  ;;  %v183_v62 = vmul.f32 %v163_v43, %v147_v46  ;;  %v184_v63 = vmul.f32 %v163_v43, %v148_v47 }
  0x98   :  { %v193_v1 = vadd.f32 %v177_v56, %v169_v48  ;;  %v203_v2 = vadd.f32 %v178_v57, %v170_v49  ;;  %v212_v7 = vadd.f32 %v179_v58, %v171_v50  ;;  %v221_v3 = vadd.f32 %v180_v59, %v172_v51 }
  0x99   :  { %v230_v4 = vadd.f32 %v181_v60, %v173_v52  ;;  %v239_v5 = vadd.f32 %v182_v61, %v174_v53  ;;  %v248_v6 = vadd.f32 %v183_v62, %v175_v54  ;;  %v257_v8 = vadd.f32 %v184_v63, %v176_v55 }
  0x9a   :  { %v185_v9 = vmul.f32 %v167_v0, %v149_v21  ;;  %v186_v10 = vmul.f32 %v167_v0, %v150_v22  ;;  %v187_v11 = vmul.f32 %v167_v0, %v151_v23  ;;  %v188_v12 = vmul.f32 %v167_v0, %v152_v24 }
  0x9b   :  { %v189_v13 = vmul.f32 %v167_v0, %v153_v25  ;;  %v190_v14 = vmul.f32 %v167_v0, %v154_v26  ;;  %v191_v15 = vmul.f32 %v167_v0, %v155_v27  ;;  %v192_v16 = vmul.f32 %v167_v0, %v156_v28 }
  0x9c   :  { %v195_v17 = vsel %vm194_vm0, %v185_v9, 0.0  ;;  %v204_v18 = vsel %vm194_vm0, %v186_v10, 0.0  ;;  %v213_v19 = vsel %vm194_vm0, %v187_v11, 0.0  ;;  %v222_v20 = vsel %vm194_vm0, %v188_v12, 0.0 }
  0x9d   :  { %v196_v29 = vadd.f32 %v195_v17, %v193_v1  ;;  %v205_v30 = vadd.f32 %v204_v18, %v203_v2  ;;  %v214_v31 = vadd.f32 %v213_v19, %v212_v7  ;;  %v223_v33 = vadd.f32 %v222_v20, %v221_v3  ;;  %v269_v2 = vpop.permute.xlu1 %268 }
  0x9e   :  { %v231_v21 = vsel %vm194_vm0, %v189_v13, 0.0  ;;  %v240_v22 = vsel %vm194_vm0, %v190_v14, 0.0  ;;  %v249_v23 = vsel %vm194_vm0, %v191_v15, 0.0  ;;  %v258_v24 = vsel %vm194_vm0, %v192_v16, 0.0 }
  0x9f   :  { %v197_v25 = vrot.slane %v196_v29, 4  ;;  %v206_v26 = vrot.slane %v205_v30, 4  ;;  %v215_v27 = vrot.slane %v214_v31, 4  ;;  %v224_v28 = vrot.slane %v223_v33, 4 }
  0xa0   :  { %v232_v34 = vadd.f32 %v231_v21, %v230_v4  ;;  %v241_v35 = vadd.f32 %v240_v22, %v239_v5  ;;  %v250_v36 = vadd.f32 %v249_v23, %v248_v6  ;;  %v259_v37 = vadd.f32 %v258_v24, %v257_v8 }
  0xa1   :  { %v198_v38 = vadd.f32 %v197_v25, %v196_v29  ;;  %v207_v39 = vadd.f32 %v206_v26, %v205_v30  ;;  %v216_v40 = vadd.f32 %v215_v27, %v214_v31  ;;  %v225_v41 = vadd.f32 %v224_v28, %v223_v33 }
  0xa2   :  { %v233_v42 = vrot.slane %v232_v34, 4  ;;  %v242_v43 = vrot.slane %v241_v35, 4  ;;  %v251_v44 = vrot.slane %v250_v36, 4  ;;  %v260_v45 = vrot.slane %v259_v37, 4 }
  0xa3   :  { %v199_v46 = vrot.slane %v198_v38, 2  ;;  %v208_v47 = vrot.slane %v207_v39, 2  ;;  %v217_v48 = vrot.slane %v216_v40, 2  ;;  %v226_v49 = vrot.slane %v225_v41, 2 }
  0xa4   :  { %v234_v50 = vadd.f32 %v233_v42, %v232_v34  ;;  %v243_v51 = vadd.f32 %v242_v43, %v241_v35  ;;  %v252_v52 = vadd.f32 %v251_v44, %v250_v36  ;;  %v261_v53 = vadd.f32 %v260_v45, %v259_v37 }
  0xa5   :  { %v200_v54 = vadd.f32 %v199_v46, %v198_v38  ;;  %v209_v55 = vadd.f32 %v208_v47, %v207_v39  ;;  %v218_v56 = vadd.f32 %v217_v48, %v216_v40  ;;  %v227_v57 = vadd.f32 %v226_v49, %v225_v41 }
  0xa6   :  { %v235_v58 = vrot.slane %v234_v50, 2  ;;  %v244_v59 = vrot.slane %v243_v51, 2  ;;  %v253_v60 = vrot.slane %v252_v52, 2  ;;  %v262_v61 = vrot.slane %v261_v53, 2 }
  0xa7   :  { %v201_v62 = vrot.slane %v200_v54, 1  ;;  %v210_v63 = vrot.slane %v209_v55, 1  ;;  %v219_v0 = vrot.slane %v218_v56, 1  ;;  %v228_v1 = vrot.slane %v227_v57, 1 }
  0xa8   :  { %v236_v7 = vadd.f32 %v235_v58, %v234_v50  ;;  %v245_v3 = vadd.f32 %v244_v59, %v243_v51  ;;  %v254_v4 = vadd.f32 %v253_v60, %v252_v52  ;;  %v263_v5 = vadd.f32 %v262_v61, %v261_v53 }
  0xa9   :  { %v202_v6 = vadd.f32 %v201_v62, %v200_v54  ;;  %v211_v8 = vadd.f32 %v210_v63, %v209_v55  ;;  %v220_v9 = vadd.f32 %v219_v0, %v218_v56  ;;  %v229_v10 = vadd.f32 %v228_v1, %v227_v57 }
  0xaa   :  { %v237_v11 = vrot.slane %v236_v7, 1  ;;  %v246_v12 = vrot.slane %v245_v3, 1  ;;  %v255_v13 = vrot.slane %v254_v4, 1  ;;  %v264_v14 = vrot.slane %v263_v5, 1 }
  0xab   :  { %v271_v15 = vadd.f32 %v269_v2, %v202_v6  ;;  %v272_v16 = vadd.f32 %v269_v2, %v211_v8  ;;  %v273_v17 = vadd.f32 %v269_v2, %v220_v9  ;;  %v274_v18 = vadd.f32 %v269_v2, %v229_v10 }
  0xac   :  { %v238_v19 = vadd.f32 %v237_v11, %v236_v7  ;;  %v247_v20 = vadd.f32 %v246_v12, %v245_v3  ;;  %v256_v29 = vadd.f32 %v255_v13, %v254_v4  ;;  %v265_v30 = vadd.f32 %v264_v14, %v263_v5 }
  0xad   :  { %v287_v31 = vcombine.low %v271_v15, %v272_v16  ;;  %v288_v33 = vcombine.low %v273_v17, %v274_v18 }
  0xae   :  { %v275_v21 = vadd.f32 %v269_v2, %v238_v19  ;;  %v276_v22 = vadd.f32 %v269_v2, %v247_v20  ;;  %v277_v23 = vadd.f32 %v269_v2, %v256_v29  ;;  %v278_v24 = vadd.f32 %v269_v2, %v265_v30 }
  0xaf   :  { %v297_v25 = vrot.slane %v287_v31, %v426_v32  ;;  %v304_v26 = vrot.slane %v288_v33, %v426_v32 }
  0xb0   :  { %v289_v27 = vcombine.low %v275_v21, %v276_v22  ;;  %v290_v28 = vcombine.low %v277_v23, %v278_v24 }
  0xb1   :  { %v319_v34 = vcombine.low %v297_v25, %v304_v26 }
  0xb2   :  { %v311_v35 = vrot.slane %v289_v27, %v426_v32  ;;  %v318_v36 = vrot.slane %v290_v28, %v426_v32 }
  0xb3   :  { %v327_v38 = vrot.slane %v319_v34, %v426_v32 }
  0xb4   :  { %v320_v37 = vcombine.low %v311_v35, %v318_v36 }
  0xb6   :  { %v334_v39 = vrot.slane %v320_v37, %v426_v32 }
  0xb8   :  { %v335_v40 = vcombine.low %v327_v38, %v334_v39 }
  0xba   :  { %337 = vst [vmem:[#allocation2] sm:$0xff] %v335_v40 }
  0xbb   :  { %377 = shalt.err (!%p374_p4)
}
  0xbc   :  { %s378_s22 = scalar_lea.hbm %s456_s2, 128 }
  0xbd   :  { %p379_p5 = scmp.ne.s32.totalorder %s456_s2, %s378_s22  ;;  %p382_p6 = scmp.lt.u32.totalorder %s378_s22, %s456_s2 }
  0xbf   :  { %p384_p7 = pnand %p382_p6, %p379_p5 }
  0xc1   :  { %387 = shalt.err (!%p384_p7)
}
  0xc2   :  { %347 = dma.vmem_to_hbm [thread:$0]  %s345_s1, 128, %s456_s2, [#allocation3]  }
  0xc3   :  { %388 = dma.done.wait [#allocation3], 128  }
  0xc4   :  { %389 = vsyncadd [#allocation3], 4294967168 }
  0xc5   :  { %351 = vsyncpa [#allocation3], 1 }

</bundles_post_ra>
